<compile_context>
chip_gen: v7x
topology: tpu7x:2x2x1
jax: 0.10.0
libtpu: 0.0.40
codegen_flags: <defaults>
</compile_context>

<pallas_src>
import functools

import jax
import jax.numpy as jnp
from jax import lax
from jax.experimental import pallas as pl
from jax.experimental.pallas import tpu as pltpu


# ------------------------------------------------------------------ kernels --

def _se_batched_kernel(x_ref, w1t_ref, b1_ref, w2t_ref, b2_ref, o_ref, *, inv_hw):
    """One batch-block: pool -> FC1+SiLU -> FC2+Sigmoid -> rescale."""
    # Squeeze: global average pool over the spatial (lane) axis, f32 accum.
    # The cast lives only inside the reduction; we do NOT hold an f32 tile copy.
    # NOTE: if a v7x bundle dump ever shows the VALU slot binding for bf16
    # streams, this sum can be moved onto the idle MXU (einsum with ones).
    pooled = jnp.sum(x_ref[...].astype(jnp.float32), axis=-1) * inv_hw     # (Bt, C)

    # Excitation: Linear(C->S) + SiLU, then Linear(S->C) + Sigmoid (f32 accum).
    h = jnp.dot(pooled.astype(w1t_ref.dtype), w1t_ref[...],
                preferred_element_type=jnp.float32,
                precision=lax.Precision.HIGHEST) + b1_ref[...].astype(jnp.float32)
    h = h * jax.nn.sigmoid(h)                                              # SiLU
    s = jnp.dot(h.astype(w2t_ref.dtype), w2t_ref[...],
                preferred_element_type=jnp.float32,
                precision=lax.Precision.HIGHEST) + b2_ref[...].astype(jnp.float32)
    s = jax.nn.sigmoid(s)                                                  # (Bt, C)

    # Scale: re-read x and multiply in the streaming dtype (packed VALU on bf16).
    o_ref[...] = x_ref[...] * s.astype(o_ref.dtype)[:, :, None]


def _se_gate_kernel(x_ref, w1t_ref, b1_ref, w2t_ref, b2_ref, g_ref, acc_ref,
                    *, inv_hw, hw, thw):
    """Spatial-tiled pool + gate (fallback path). Grid = (B, num HW blocks)."""
    hi = pl.program_id(1)

    @pl.when(hi == 0)
    def _():
        acc_ref[...] = jnp.zeros_like(acc_ref)

    x = x_ref[...].astype(jnp.float32)                                     # (1, C, THW)
    # Mask lanes past the true spatial extent (ragged final HW block reads
    # undefined padding; zero it before accumulating).
    lane = lax.broadcasted_iota(jnp.int32, x.shape, 2)
    x = jnp.where(hi * thw + lane < hw, x, 0.0)
    acc_ref[...] += jnp.sum(x, axis=-1)                                    # (1, C)

    @pl.when(hi == pl.num_programs(1) - 1)
    def _():
        pooled = acc_ref[...] * inv_hw                                     # (1, C)
        h = jnp.dot(pooled.astype(w1t_ref.dtype), w1t_ref[...],
                    preferred_element_type=jnp.float32,
                    precision=lax.Precision.HIGHEST) + b1_ref[...].astype(jnp.float32)
        h = h * jax.nn.sigmoid(h)
        s = jnp.dot(h.astype(w2t_ref.dtype), w2t_ref[...],
                    preferred_element_type=jnp.float32,
                    precision=lax.Precision.HIGHEST) + b2_ref[...].astype(jnp.float32)
        g_ref[...] = jax.nn.sigmoid(s)[:, :, None]                         # (1, C, 1)


def _se_rescale_kernel(x_ref, g_ref, o_ref):
    """Spatial-tiled rescale (fallback path): o = x * gate, streaming dtype."""
    o_ref[...] = x_ref[...] * g_ref[...].astype(o_ref.dtype)


# --------------------------------------------------------- sizing heuristics --

def _physical_vmem_bytes():
    """Per-core VMEM capacity; conservative (v7x = 64 MiB) if unqueryable."""
    try:
        v = getattr(pltpu.get_tpu_info(), "vmem_capacity_bytes", None)
        if v:
            return int(v)
    except Exception:
        pass
    return 64 << 20


def _num_tensorcores():
    """TensorCores a single 'parallel' grid axis can be sharded across."""
    try:
        kind = jax.devices()[0].device_kind.lower()
    except Exception:
        return 1
    # v4 / v5p megacore and v7x have 2 TCs per device; v5e / v6e have one.
    if any(t in kind for t in ("v7", "v5p", "v4")):
        return 2
    return 1


def _pad2_bytes(r, c, itemsize):
    return ((r + 7) // 8 * 8) * ((c + 127) // 128 * 128) * itemsize


def _weight_vmem_bytes(C, S, itemsize):
    # (C,S) + (1,S) + (S,C) + (1,C), padded to (8,128) tiles; x2 in case the
    # constant blocks end up double-buffered (Buffered(1) unsupported).
    return 2 * (_pad2_bytes(C, S, itemsize) + _pad2_bytes(1, S, itemsize)
                + _pad2_bytes(S, C, itemsize) + _pad2_bytes(1, C, itemsize))


def _vmem_limit_bytes(tile_bytes, weight_bytes, physical):
    need = 4 * tile_bytes + weight_bytes + (4 << 20)      # 4 live tiles + slack
    return int(min(physical * 9 // 10, max(32 << 20, need)))


def _pick_block_batch(B, bytes_per_batch, budget_bytes, weight_bytes, n_cores,
                      target_tile_bytes=6 << 20):
    """Batch-block size: ~4-8 MiB tiles, 4 live tiles within the VMEM budget,
    >=2 pipelined steps per TensorCore on multi-TC parts, and divides B."""
    avail = max(budget_bytes - weight_bytes, 4 * bytes_per_batch)
    bt = max(1, target_tile_bytes // bytes_per_batch)
    cap = max(1, avail // (4 * bytes_per_batch))          # in+out double-buffered
    bt = int(min(bt, cap, B))
    if n_cores > 1 and B >= 2 * n_cores:
        bt = min(bt, B // (2 * n_cores))                  # >=2 steps per TC
    # Single-TC parts: keep the largest tile that fits (no forced splitting).
    bt = max(1, int(bt))
    while B % bt:                                         # Bt must divide B
        bt -= 1
    return bt


# ------------------------------------------------------------------ drivers --

def _const_weight_specs(shapes, single_buffer):
    """Constant-index (VMEM-resident) specs; optionally single-buffered."""
    kw = {"pipeline_mode": pl.Buffered(1)} if single_buffer else {}
    return [pl.BlockSpec(s, lambda *_: (0, 0), **kw) for s in shapes]


def _se_batched_call(x_flat, w1t, b1r, w2t, b2r, *, bt, vmem_limit):
    B, C, HW = x_flat.shape
    S = w1t.shape[1]
    kernel = functools.partial(_se_batched_kernel, inv_hw=float(1.0 / HW))

    def build(single_buffer_weights):
        return pl.pallas_call(
            kernel,
            out_shape=jax.ShapeDtypeStruct((B, C, HW), x_flat.dtype),
            grid_spec=pltpu.PrefetchScalarGridSpec(
                num_scalar_prefetch=0,
                grid=(B // bt,),
                in_specs=[pl.BlockSpec((bt, C, HW), lambda b: (b, 0, 0))]
                         + _const_weight_specs([(C, S), (1, S), (S, C), (1, C)],
                                               single_buffer_weights),
                out_specs=pl.BlockSpec((bt, C, HW), lambda b: (b, 0, 0)),
            ),
            compiler_params=pltpu.CompilerParams(
                dimension_semantics=("parallel",),
                vmem_limit_bytes=vmem_limit),
        )

    try:      # single-buffer constant weight blocks when the runtime allows it
        return build(True)(x_flat, w1t, b1r, w2t, b2r)
    except Exception:
        return build(False)(x_flat, w1t, b1r, w2t, b2r)


def _se_spatial_call(x_flat, w1t, b1r, w2t, b2r, *, thw, vmem_phys, weight_bytes):
    B, C, HW = x_flat.shape
    S = w1t.shape[1]
    n_hw = pl.cdiv(HW, thw)
    tile_bytes = C * thw * x_flat.dtype.itemsize
    vmem_limit = _vmem_limit_bytes(tile_bytes, weight_bytes, vmem_phys)

    gate_kernel = functools.partial(_se_gate_kernel, inv_hw=float(1.0 / HW),
                                    hw=HW, thw=thw)

    def build_gate(single_buffer_weights):
        return pl.pallas_call(
            gate_kernel,
            out_shape=jax.ShapeDtypeStruct((B, C, 1), jnp.float32),
            grid_spec=pltpu.PrefetchScalarGridSpec(
                num_scalar_prefetch=0,
                grid=(B, n_hw),
                in_specs=[pl.BlockSpec((1, C, thw), lambda b, h: (b, 0, h))]
                         + _const_weight_specs([(C, S), (1, S), (S, C), (1, C)],
                                               single_buffer_weights),
                out_specs=pl.BlockSpec((1, C, 1), lambda b, h: (b, 0, 0)),
                scratch_shapes=[pltpu.VMEM((1, C), jnp.float32)],
            ),
            compiler_params=pltpu.CompilerParams(
                dimension_semantics=("parallel", "arbitrary"),
                vmem_limit_bytes=vmem_limit),
        )

    try:
        gates = build_gate(True)(x_flat, w1t, b1r, w2t, b2r)
    except Exception:
        gates = build_gate(False)(x_flat, w1t, b1r, w2t, b2r)

    out_flat = pl.pallas_call(
        _se_rescale_kernel,
        out_shape=jax.ShapeDtypeStruct((B, C, HW), x_flat.dtype),
        grid_spec=pltpu.PrefetchScalarGridSpec(
            num_scalar_prefetch=0,
            grid=(B, n_hw),
            in_specs=[pl.BlockSpec((1, C, thw), lambda b, h: (b, 0, h)),
                      pl.BlockSpec((1, C, 1), lambda b, h: (b, 0, 0))],
            out_specs=pl.BlockSpec((1, C, thw), lambda b, h: (b, 0, h)),
        ),
        compiler_params=pltpu.CompilerParams(
            dimension_semantics=("parallel", "parallel"),
            vmem_limit_bytes=vmem_limit),
    )(x_flat, gates)
    return out_flat


def se_block(x, w1, b1, w2, b2, *, force_spatial_tiling=False, spatial_block=None):
    """SEBlock.forward.  x: (B,C,H,W); w1: (S,C); b1: (S,); w2: (C,S); b2: (C,).
    Matches PyTorch nn.Linear semantics (y = x @ W.T + b)."""
    B, C, H, W = x.shape
    S = w1.shape[0]
    HW = H * W

    # Metadata-only view; no pad / slice extra HBM passes.
    x_flat = x.reshape(B, C, HW)

    # Keep weights in their native dtype (bf16 stays bf16); MXU accumulates f32.
    w1t = jnp.asarray(w1).T                 # (C, S)
    b1r = jnp.asarray(b1).reshape(1, S)
    w2t = jnp.asarray(w2).T                 # (S, C)
    b2r = jnp.asarray(b2).reshape(1, C)

    vmem_phys = _physical_vmem_bytes()
    n_cores = _num_tensorcores()
    budget = vmem_phys * 3 // 4             # generation-aware working-set budget
    itemsize = x_flat.dtype.itemsize
    per_batch = C * HW * itemsize
    weight_bytes = _weight_vmem_bytes(C, S, w1t.dtype.itemsize)

    fits_batched = 4 * per_batch + weight_bytes <= budget

    if fits_batched and not force_spatial_tiling:
        bt = _pick_block_batch(B, per_batch, budget, weight_bytes, n_cores)
        vmem_limit = _vmem_limit_bytes(bt * per_batch, weight_bytes, vmem_phys)
        out_flat = _se_batched_call(x_flat, w1t, b1r, w2t, b2r,
                                    bt=bt, vmem_limit=vmem_limit)
    else:
        # Spatial-tiled fallback: one batch element's (1, C, HW) tile exceeds
        # the VMEM budget -> stream HW blocks (pool+gate kernel, rescale kernel).
        if spatial_block is not None:
            thw = int(spatial_block)
        else:
            per_lane = C * itemsize
            thw = min((6 << 20) // per_lane,
                      max(1, (budget - weight_bytes) // (4 * per_lane)))
            thw = max(128, (thw // 128) * 128)   # lane-dense multiple of 128
        if thw >= HW:
            thw = HW                             # single full-extent block
        out_flat = _se_spatial_call(x_flat, w1t, b1r, w2t, b2r, thw=thw,
                                    vmem_phys=vmem_phys, weight_bytes=weight_bytes)

    return out_flat.reshape(B, C, H, W)


# ---------------------------------------------------------------- reference --

def se_block_ref(x, w1, b1, w2, b2):
    """Pure-JAX reference mirroring the PyTorch module (high-precision dots)."""
    pooled = jnp.mean(x, axis=(2, 3))
    h = jnp.dot(pooled, w1.T, precision=lax.Precision.HIGHEST) + b1
    h = h * jax.nn.sigmoid(h)
    s = jax.nn.sigmoid(jnp.dot(h, w2.T, precision=lax.Precision.HIGHEST) + b2)
    return x * s[:, :, None, None]


def _make_params(key, C, S):
    k_w1, k_b1, k_w2, k_b2 = jax.random.split(key, 4)
    bound1 = 1.0 / (C ** 0.5)
    w1 = jax.random.uniform(k_w1, (S, C), jnp.float32, -bound1, bound1)
    b1 = jax.random.uniform(k_b1, (S,), jnp.float32, -bound1, bound1)
    bound2 = 1.0 / (S ** 0.5)
    w2 = jax.random.uniform(k_w2, (C, S), jnp.float32, -bound2, bound2)
    b2 = jax.random.uniform(k_b2, (C,), jnp.float32, -bound2, bound2)
    return w1, b1, w2, b2


def _check(name, out, ref):
    assert out.shape == ref.shape, f"shape mismatch ({name})"
    assert jnp.allclose(out, ref, atol=2e-5, rtol=2e-5), f"value mismatch ({name})"


if __name__ == "__main__":
    key = jax.random.PRNGKey(0)
    k1, k2, k3, k4, k5, k6, k7, k8 = jax.random.split(key, 8)

    # 1) Batched fast path, spatial size a multiple of 128 (unmasked stores).
    B, C, S, H, W = 2, 8, 4, 16, 16
    x = jax.random.normal(k1, (B, C, H, W), dtype=jnp.float32)
    p = _make_params(k2, C, S)
    out = jax.block_until_ready(se_block(x, *p))
    _check("batched/aligned", out, se_block_ref(x, *p))

    # 2) Batched fast path, ragged spatial size (HW=49): no wrapper pad/slice,
    #    just masked tail stores inside the kernel.
    x2 = jax.random.normal(k3, (4, 12, 7, 7), dtype=jnp.float32)
    p2 = _make_params(k4, 12, 6)
    out2 = jax.block_until_ready(se_block(x2, *p2))
    _check("batched/ragged", out2, se_block_ref(x2, *p2))

    # 3) Spatial-tiled fallback (forced), HW=256 split into two 128-lane blocks.
    x3 = jax.random.normal(k5, (2, 8, 16, 16), dtype=jnp.float32)
    p3 = _make_params(k6, 8, 4)
    out3 = jax.block_until_ready(
        se_block(x3, *p3, force_spatial_tiling=True, spatial_block=128))
    _check("spatial/aligned", out3, se_block_ref(x3, *p3))

    # 4) Spatial-tiled fallback (forced), ragged final HW block (HW=144).
    x4 = jax.random.normal(k7, (2, 8, 12, 12), dtype=jnp.float32)
    p4 = _make_params(k8, 8, 4)
    out4 = jax.block_until_ready(
        se_block(x4, *p4, force_spatial_tiling=True, spatial_block=128))
    _check("spatial/ragged", out4, se_block_ref(x4, *p4))

    print("KERNEL_OK")
</pallas_src>

<mosaic_0001>
module attributes {stable_mosaic.version = 11 : i64} {
  func.func @_se_batched_kernel(%arg0: i32, %arg1: memref<2x8x256xf32, #tpu.memory_space<vmem>>, %arg2: memref<8x4xf32, #tpu.memory_space<vmem>>, %arg3: memref<1x4xf32, #tpu.memory_space<vmem>>, %arg4: memref<4x8xf32, #tpu.memory_space<vmem>>, %arg5: memref<1x8xf32, #tpu.memory_space<vmem>>, %arg6: memref<2x8x256xf32, #tpu.memory_space<vmem>>) attributes {dimension_semantics = [#tpu.dimension_semantics<parallel>], iteration_bounds = array<i64: 1>, scalar_prefetch = 0 : i64, scratch_operands = 0 : i64, tpu.core_type = #tpu.core_type<tc>, window_params = [{transform_indices = @transform_0, window_bounds = array<i64: 2, 8, 256>}, {pipeline_mode = #tpu.pipeline_mode<synchronous>, transform_indices = @transform_1, window_bounds = array<i64: 8, 4>}, {pipeline_mode = #tpu.pipeline_mode<synchronous>, transform_indices = @transform_2, window_bounds = array<i64: 1, 4>}, {pipeline_mode = #tpu.pipeline_mode<synchronous>, transform_indices = @transform_3, window_bounds = array<i64: 4, 8>}, {pipeline_mode = #tpu.pipeline_mode<synchronous>, transform_indices = @transform_4, window_bounds = array<i64: 1, 8>}, {transform_indices = @transform_5, window_bounds = array<i64: 2, 8, 256>}]} {
    %c0 = arith.constant 0 : index
    %c0_0 = arith.constant 0 : index
    %c0_1 = arith.constant 0 : index
    %0 = vector.load %arg1[%c0, %c0_0, %c0_1] : memref<2x8x256xf32, #tpu.memory_space<vmem>>, vector<2x8x256xf32>
    %cst = arith.constant dense<0.000000e+00> : vector<2x8xf32>
    %1 = vector.multi_reduction <add>, %0, %cst [2] : vector<2x8x256xf32> to vector<2x8xf32>
    %cst_2 = arith.constant 3.906250e-03 : f32
    %2 = vector.broadcast %cst_2 : f32 to vector<2x8xf32>
    %3 = arith.mulf %1, %2 : vector<2x8xf32>
    %c0_3 = arith.constant 0 : index
    %c0_4 = arith.constant 0 : index
    %4 = vector.load %arg2[%c0_3, %c0_4] : memref<8x4xf32, #tpu.memory_space<vmem>>, vector<8x4xf32>
    %cst_5 = arith.constant dense<0.000000e+00> : vector<2x4xf32>
    %5 = tpu.matmul %3, %4, %cst_5 {dimension_numbers = #tpu.dot_dimension_numbers<[1], [0], [0], [1], [0, 0, 1, 1], [], []>, precision = #tpu.contract_precision<fp32>} : vector<2x8xf32>, vector<8x4xf32>, vector<2x4xf32> -> vector<2x4xf32>
    %c0_6 = arith.constant 0 : index
    %c0_7 = arith.constant 0 : index
    %6 = vector.load %arg3[%c0_6, %c0_7] : memref<1x4xf32, #tpu.memory_space<vmem>>, vector<1x4xf32>
    %7 = vector.broadcast %6 : vector<1x4xf32> to vector<2x4xf32>
    %8 = arith.addf %5, %7 : vector<2x4xf32>
    %9 = arith.negf %8 : vector<2x4xf32>
    %10 = math.exp %9 : vector<2x4xf32>
    %cst_8 = arith.constant 1.000000e+00 : f32
    %11 = vector.broadcast %cst_8 : f32 to vector<2x4xf32>
    %12 = arith.addf %11, %10 : vector<2x4xf32>
    %13 = arith.divf %11, %12 : vector<2x4xf32>
    %14 = arith.mulf %8, %13 : vector<2x4xf32>
    %c0_9 = arith.constant 0 : index
    %c0_10 = arith.constant 0 : index
    %15 = vector.load %arg4[%c0_9, %c0_10] : memref<4x8xf32, #tpu.memory_space<vmem>>, vector<4x8xf32>
    %cst_11 = arith.constant dense<0.000000e+00> : vector<2x8xf32>
    %16 = tpu.matmul %14, %15, %cst_11 {dimension_numbers = #tpu.dot_dimension_numbers<[1], [0], [0], [1], [0, 0, 1, 1], [], []>, precision = #tpu.contract_precision<fp32>} : vector<2x4xf32>, vector<4x8xf32>, vector<2x8xf32> -> vector<2x8xf32>
    %c0_12 = arith.constant 0 : index
    %c0_13 = arith.constant 0 : index
    %17 = vector.load %arg5[%c0_12, %c0_13] : memref<1x8xf32, #tpu.memory_space<vmem>>, vector<1x8xf32>
    %18 = vector.broadcast %17 : vector<1x8xf32> to vector<2x8xf32>
    %19 = arith.addf %16, %18 : vector<2x8xf32>
    %20 = arith.negf %19 : vector<2x8xf32>
    %21 = math.exp %20 : vector<2x8xf32>
    %cst_14 = arith.constant 1.000000e+00 : f32
    %22 = vector.broadcast %cst_14 : f32 to vector<2x8xf32>
    %23 = arith.addf %22, %21 : vector<2x8xf32>
    %24 = arith.divf %22, %23 : vector<2x8xf32>
    %c0_15 = arith.constant 0 : index
    %c0_16 = arith.constant 0 : index
    %c0_17 = arith.constant 0 : index
    %25 = vector.load %arg1[%c0_15, %c0_16, %c0_17] : memref<2x8x256xf32, #tpu.memory_space<vmem>>, vector<2x8x256xf32>
    %26 = vector.shape_cast %24 : vector<2x8xf32> to vector<2x8x1xf32>
    %27 = vector.broadcast %26 : vector<2x8x1xf32> to vector<2x8x256xf32>
    %28 = arith.mulf %25, %27 : vector<2x8x256xf32>
    %c0_18 = arith.constant 0 : index
    %c0_19 = arith.constant 0 : index
    %c0_20 = arith.constant 0 : index
    %29 = vector.load %arg6[%c0_18, %c0_19, %c0_20] : memref<2x8x256xf32, #tpu.memory_space<vmem>>, vector<2x8x256xf32>
    tpu.vector_store %arg6[%c0_18, %c0_19, %c0_20], %28 {strides = array<i32>} : memref<2x8x256xf32, #tpu.memory_space<vmem>>, vector<2x8x256xf32>,
    return
  }
  func.func @transform_0(%arg0: i32) -> (i32, i32, i32) {
    %c0_i32 = arith.constant 0 : i32
    %c0_i32_0 = arith.constant 0 : i32
    %c0_i32_1 = arith.constant 0 : i32
    return %arg0, %c0_i32, %c0_i32_0 : i32, i32, i32
  }
  func.func @transform_1(%arg0: i32) -> (i32, i32) {
    %c0_i32 = arith.constant 0 : i32
    %c0_i32_0 = arith.constant 0 : i32
    %c0_i32_1 = arith.constant 0 : i32
    return %c0_i32, %c0_i32_0 : i32, i32
  }
  func.func @transform_2(%arg0: i32) -> (i32, i32) {
    %c0_i32 = arith.constant 0 : i32
    %c0_i32_0 = arith.constant 0 : i32
    %c0_i32_1 = arith.constant 0 : i32
    return %c0_i32, %c0_i32_0 : i32, i32
  }
  func.func @transform_3(%arg0: i32) -> (i32, i32) {
    %c0_i32 = arith.constant 0 : i32
    %c0_i32_0 = arith.constant 0 : i32
    %c0_i32_1 = arith.constant 0 : i32
    return %c0_i32, %c0_i32_0 : i32, i32
  }
  func.func @transform_4(%arg0: i32) -> (i32, i32) {
    %c0_i32 = arith.constant 0 : i32
    %c0_i32_0 = arith.constant 0 : i32
    %c0_i32_1 = arith.constant 0 : i32
    return %c0_i32, %c0_i32_0 : i32, i32
  }
  func.func @transform_5(%arg0: i32) -> (i32, i32, i32) {
    %c0_i32 = arith.constant 0 : i32
    %c0_i32_0 = arith.constant 0 : i32
    %c0_i32_1 = arith.constant 0 : i32
    return %arg0, %c0_i32, %c0_i32_0 : i32, i32, i32
  }
}

module attributes {stable_mosaic.version = 11 : i64} {
  func.func @_se_batched_kernel(%arg0: i32, %arg1: memref<2x8x256xf32, #tpu.memory_space<vmem>>, %arg2: memref<8x4xf32, #tpu.memory_space<vmem>>, %arg3: memref<1x4xf32, #tpu.memory_space<vmem>>, %arg4: memref<4x8xf32, #tpu.memory_space<vmem>>, %arg5: memref<1x8xf32, #tpu.memory_space<vmem>>, %arg6: memref<2x8x256xf32, #tpu.memory_space<vmem>>) attributes {dimension_semantics = [#tpu.dimension_semantics<parallel>], iteration_bounds = array<i64: 1>, scalar_prefetch = 0 : i64, scratch_operands = 0 : i64, tpu.core_type = #tpu.core_type<tc>, window_params = [{transform_indices = @transform_0, window_bounds = array<i64: 2, 8, 256>}, {pipeline_mode = #tpu.pipeline_mode<synchronous>, transform_indices = @transform_1, window_bounds = array<i64: 8, 4>}, {pipeline_mode = #tpu.pipeline_mode<synchronous>, transform_indices = @transform_2, window_bounds = array<i64: 1, 4>}, {pipeline_mode = #tpu.pipeline_mode<synchronous>, transform_indices = @transform_3, window_bounds = array<i64: 4, 8>}, {pipeline_mode = #tpu.pipeline_mode<synchronous>, transform_indices = @transform_4, window_bounds = array<i64: 1, 8>}, {transform_indices = @transform_5, window_bounds = array<i64: 2, 8, 256>}]} {
    %c0 = arith.constant 0 : index
    %c0_0 = arith.constant 0 : index
    %c0_1 = arith.constant 0 : index
    %0 = vector.load %arg1[%c0, %c0_0, %c0_1] : memref<2x8x256xf32, #tpu.memory_space<vmem>>, vector<2x8x256xf32>
    %cst = arith.constant dense<0.000000e+00> : vector<2x8xf32>
    %1 = vector.multi_reduction <add>, %0, %cst [2] : vector<2x8x256xf32> to vector<2x8xf32>
    %cst_2 = arith.constant 3.906250e-03 : f32
    %2 = vector.broadcast %cst_2 : f32 to vector<2x8xf32>
    %3 = arith.mulf %1, %2 : vector<2x8xf32>
    %c0_3 = arith.constant 0 : index
    %c0_4 = arith.constant 0 : index
    %4 = vector.load %arg2[%c0_3, %c0_4] : memref<8x4xf32, #tpu.memory_space<vmem>>, vector<8x4xf32>
    %cst_5 = arith.constant dense<0.000000e+00> : vector<2x4xf32>
    %5 = tpu.matmul %3, %4, %cst_5 {dimension_numbers = #tpu.dot_dimension_numbers<[1], [0], [0], [1], [0, 0, 1, 1], [], []>, precision = #tpu.contract_precision<fp32>} : vector<2x8xf32>, vector<8x4xf32>, vector<2x4xf32> -> vector<2x4xf32>
    %c0_6 = arith.constant 0 : index
    %c0_7 = arith.constant 0 : index
    %6 = vector.load %arg3[%c0_6, %c0_7] : memref<1x4xf32, #tpu.memory_space<vmem>>, vector<1x4xf32>
    %7 = vector.broadcast %6 : vector<1x4xf32> to vector<2x4xf32>
    %8 = arith.addf %5, %7 : vector<2x4xf32>
    %9 = arith.negf %8 : vector<2x4xf32>
    %10 = math.exp %9 : vector<2x4xf32>
    %cst_8 = arith.constant 1.000000e+00 : f32
    %11 = vector.broadcast %cst_8 : f32 to vector<2x4xf32>
    %12 = arith.addf %11, %10 : vector<2x4xf32>
    %13 = arith.divf %11, %12 : vector<2x4xf32>
    %14 = arith.mulf %8, %13 : vector<2x4xf32>
    %c0_9 = arith.constant 0 : index
    %c0_10 = arith.constant 0 : index
    %15 = vector.load %arg4[%c0_9, %c0_10] : memref<4x8xf32, #tpu.memory_space<vmem>>, vector<4x8xf32>
    %cst_11 = arith.constant dense<0.000000e+00> : vector<2x8xf32>
    %16 = tpu.matmul %14, %15, %cst_11 {dimension_numbers = #tpu.dot_dimension_numbers<[1], [0], [0], [1], [0, 0, 1, 1], [], []>, precision = #tpu.contract_precision<fp32>} : vector<2x4xf32>, vector<4x8xf32>, vector<2x8xf32> -> vector<2x8xf32>
    %c0_12 = arith.constant 0 : index
    %c0_13 = arith.constant 0 : index
    %17 = vector.load %arg5[%c0_12, %c0_13] : memref<1x8xf32, #tpu.memory_space<vmem>>, vector<1x8xf32>
    %18 = vector.broadcast %17 : vector<1x8xf32> to vector<2x8xf32>
    %19 = arith.addf %16, %18 : vector<2x8xf32>
    %20 = arith.negf %19 : vector<2x8xf32>
    %21 = math.exp %20 : vector<2x8xf32>
    %cst_14 = arith.constant 1.000000e+00 : f32
    %22 = vector.broadcast %cst_14 : f32 to vector<2x8xf32>
    %23 = arith.addf %22, %21 : vector<2x8xf32>
    %24 = arith.divf %22, %23 : vector<2x8xf32>
    %c0_15 = arith.constant 0 : index
    %c0_16 = arith.constant 0 : index
    %c0_17 = arith.constant 0 : index
    %25 = vector.load %arg1[%c0_15, %c0_16, %c0_17] : memref<2x8x256xf32, #tpu.memory_space<vmem>>, vector<2x8x256xf32>
    %26 = vector.shape_cast %24 : vector<2x8xf32> to vector<2x8x1xf32>
    %27 = vector.broadcast %26 : vector<2x8x1xf32> to vector<2x8x256xf32>
    %28 = arith.mulf %25, %27 : vector<2x8x256xf32>
    %c0_18 = arith.constant 0 : index
    %c0_19 = arith.constant 0 : index
    %c0_20 = arith.constant 0 : index
    %29 = vector.load %arg6[%c0_18, %c0_19, %c0_20] : memref<2x8x256xf32, #tpu.memory_space<vmem>>, vector<2x8x256xf32>
    tpu.vector_store %arg6[%c0_18, %c0_19, %c0_20], %28 {strides = array<i32>} : memref<2x8x256xf32, #tpu.memory_space<vmem>>, vector<2x8x256xf32>,
    return
  }
  func.func @transform_0(%arg0: i32) -> (i32, i32, i32) {
    %c0_i32 = arith.constant 0 : i32
    %c0_i32_0 = arith.constant 0 : i32
    %c0_i32_1 = arith.constant 0 : i32
    return %arg0, %c0_i32, %c0_i32_0 : i32, i32, i32
  }
  func.func @transform_1(%arg0: i32) -> (i32, i32) {
    %c0_i32 = arith.constant 0 : i32
    %c0_i32_0 = arith.constant 0 : i32
    %c0_i32_1 = arith.constant 0 : i32
    return %c0_i32, %c0_i32_0 : i32, i32
  }
  func.func @transform_2(%arg0: i32) -> (i32, i32) {
    %c0_i32 = arith.constant 0 : i32
    %c0_i32_0 = arith.constant 0 : i32
    %c0_i32_1 = arith.constant 0 : i32
    return %c0_i32, %c0_i32_0 : i32, i32
  }
  func.func @transform_3(%arg0: i32) -> (i32, i32) {
    %c0_i32 = arith.constant 0 : i32
    %c0_i32_0 = arith.constant 0 : i32
    %c0_i32_1 = arith.constant 0 : i32
    return %c0_i32, %c0_i32_0 : i32, i32
  }
  func.func @transform_4(%arg0: i32) -> (i32, i32) {
    %c0_i32 = arith.constant 0 : i32
    %c0_i32_0 = arith.constant 0 : i32
    %c0_i32_1 = arith.constant 0 : i32
    return %c0_i32, %c0_i32_0 : i32, i32
  }
  func.func @transform_5(%arg0: i32) -> (i32, i32, i32) {
    %c0_i32 = arith.constant 0 : i32
    %c0_i32_0 = arith.constant 0 : i32
    %c0_i32_1 = arith.constant 0 : i32
    return %arg0, %c0_i32, %c0_i32_0 : i32, i32, i32
  }
}

</mosaic_0001>

<bundles_post_ra>
// kernel: tpu_custom_call.1
= control target key start
LH: loop header
LB: loop body
LE: loop exit
PB: predicated region body
PF: predicated region fallthrough
CT: control target
= control target key end

     0   :  { %10 = vsyncpa [#allocation3], 0  ;;  %s1339_s0 = inlined_call_operand.hbm [shape: f32[2,8,256], index: 0, kind: input, shape index: {}]   ;;  %s1340_s1 = inlined_call_operand.vmem [shape: f32[8,4], index: 1, kind: input, shape index: {}]   ;;  %s1341_s2 = inlined_call_operand.vmem [shape: f32[1,4], index: 2, kind: input, shape index: {}]   ;;  %s1342_s3 = inlined_call_operand.vmem [shape: f32[4,8], index: 3, kind: input, shape index: {}]   ;;  %s1343_s4 = inlined_call_operand.vmem [shape: f32[1,8], index: 4, kind: input, shape index: {}]   ;;  %s1344_s5 = inlined_call_operand.hbm [shape: f32[2,8,256], index: 5, kind: output, shape index: {}]  }
   0x1   :  { %11 = vsyncpa [#allocation4], 0  ;;  %s1204_s18 = smov [#allocation2]   ;;  %s1156_s22 = scalar_lea.hbm %s1339_s0, 512 }
   0x2   :  { %s17_s19 = sshll.u32 %s1204_s18, 4  ;;  %p1157_p0 = scmp.ne.s32.totalorder %s1339_s0, %s1156_s22  ;;  %s18_s19 = int_to_ptr.vmem [resolvable:$true] %s17_s19 }
   0x3   :  { %p1160_p1 = scmp.lt.u32.totalorder %s1156_s22, %s1339_s0 }
   0x5   :  { %p1162_p2 = pnand %p1160_p1, %p1157_p0 }
   0x7   :  { %1165 = shalt.err (!%p1162_p2)
}
   0x8   :  { %s1166_s27 = scalar_lea.vmem %s18_s19, 512  ;;  %p1171_p4 = scmp.lt.s32.totalorder %s18_s19, %s18_s19 }
   0x9   :  { %p1167_p3 = scmp.ne.s32.totalorder %s18_s19, %s1166_s27  ;;  %p1172_p5 = scmp.lt.s32.totalorder %s1166_s27, %s1166_s27 }
   0xb   :  { %p1173_p6 = por %p1172_p5, %p1171_p4 }
   0xd   :  { %p1174_p7 = pnand %p1173_p6, %p1167_p3 }
   0xf   :  { %1177 = shalt.err (!%p1174_p7)
}
  0x10   :  { %s1205_s28 = smov 256   ;;  %s1206_s29 = smov 16  }
  0x11   :  { %23 = dma.hbm_to_vmem [thread:$0]  %s1339_s0, 512, %s18_s19, [#allocation3], %s1205_s28, %s1205_s28, %s1206_s29  }
  0x12   :  { %1200 = dma.done.wait [#allocation3], 512  }
  0x13   :  { %1201 = vsyncadd [#allocation3], 4294966784  ;;  %v1255_v0 = vld [vmem:[#allocation2] sm:$0xff]  ;;  %v1257_v1 = vld [vmem:[#allocation2 + $0x8] sm:$0xff]  ;;  %v1207_v7 = vmov 0.0   ;;  %vm1208_vm0 = vmmov 0   ;;  %v57_v9 = vlaneseq }
  0x14   :  { %v1259_v2 = vld [vmem:[#allocation2 + $0x10] sm:$0xff]  ;;  %v39_v3 = vadd.f32 %v1257_v1, %v1255_v0  ;;  %v1263_v4 = vld [vmem:[#allocation2 + $0x18] sm:$0xff]  ;;  %v47_v6 = vld [vmem:[%s1340_s1] sm:$0xff]  ;;  %1060 = vmatprep.subr.mxu0 %v1207_v7  ;;  %1062 = vmatprep.mubr.msk.f32.mxu0 %vm1208_vm0, %v1207_v7  ;;  %vm67_vm1 = vcmask 1041409   ;;  %vm69_vm2 = vcmask 64512   ;;  %vm537_vm3 = vcmask 1043456  }
  0x15   :  { %v42_v5 = vadd.f32 %v1263_v4, %v1259_v2  ;;  %v73_v8 = vand.u32 4294901760, %v47_v6  ;;  %1090 = vmatprep.subr.mxu1 %v1207_v7  ;;  %1092 = vmatprep.mubr.msk.f32.mxu1 %vm1208_vm0, %v1207_v7  ;;  %v58_v10 = vand.u32 127, %v57_v9  ;;  %v1277_v11 = vshrl.u32 %v57_v9, 7  ;;  %v525_v30 = vld [vmem:[%s1342_s3] sm:$0xf] }
  0x16   :  { %40 = vadd.xlane.f32.xlu0 %v39_v3  ;;  %v539_v31 = vsel %vm537_vm3, %v525_v30, 0  ;;  %v1032_v33 = vld [vmem:[%s1341_s2] ss:$0 sm:$0xff]  ;;  %vm533_vm4 = vcmask 31744  }
  0x17   :  { %1061 = vmatpush3.msra.mxu0 %v73_v8  ;;  %v61_v13 = vsub.s32 %v58_v10, %v1277_v11  ;;  %v150_v17 = vsub.f32 %v47_v6, %v73_v8  ;;  %v542_v32 = vand.u32 4294901760, %v539_v31  ;;  %v1034_v52 = vld [vmem:[%s1343_s4] ss:$0 sm:$0xff]  ;;  %v995_v59 = vsub.s32 0, %v1277_v11  ;;  %s1209_s4 = smov [#allocation5]  }
  0x18   :  { %1065 = vmatprep.subr.mxu0 %v1207_v7  ;;  %v1002_v62 = vsub.s32 1, %v1277_v11  ;;  %s1020_s11 = sshll.u32 %s1209_s4, 4  ;;  %s1021_s11 = int_to_ptr.vmem [resolvable:$true] %s1020_s11 }
  0x19   :  { %v151_v22 = vand.u32 4294901760, %v150_v17  ;;  %1091 = vmatpush3.msra.mxu1 %v542_v32  ;;  %v619_v40 = vsub.f32 %v539_v31, %v542_v32  ;;  %s1178_s12 = scalar_lea.vmem %s1021_s11, 512  ;;  %p1183_p9 = scmp.lt.s32.totalorder %s1021_s11, %s1021_s11 }
  0x1a   :  { %43 = vadd.xlane.f32.xlu0 %v42_v5  ;;  %1095 = vmatprep.subr.mxu1 %v1207_v7  ;;  %p1179_p8 = scmp.ne.s32.totalorder %s1021_s11, %s1178_s12  ;;  %p1184_p10 = scmp.lt.s32.totalorder %s1178_s12, %s1178_s12 }
  0x1b   :  { %v152_v25 = vsub.f32 %v150_v17, %v151_v22  ;;  %v620_v44 = vand.u32 4294901760, %v619_v40 }
  0x1c   :  { %p1185_p11 = por %p1184_p10, %p1183_p9 }
  0x1d   :  { %v153_v28 = vand.u32 4294901760, %v152_v25  ;;  %v621_v47 = vsub.f32 %v619_v40, %v620_v44 }
  0x1e   :  { %p1186_p12 = pnand %p1185_p11, %p1179_p8 }
  0x1f   :  { %v622_v50 = vand.u32 4294901760, %v621_v47 }
  0xa3   :  { %v41_v12 = vpop.xlane.xlu0 %40 }
  0xa4   :  { %v45_v14 = vmul.f32 0.00390625, %v41_v12 }
  0xa6   :  { %v62_v18 = vrot.slane %v45_v14, %v61_v13 }
  0xa7   :  { %v44_v15 = vpop.xlane.xlu0 %43 }
  0xa8   :  { %v46_v16 = vmul.f32 0.00390625, %v44_v15 }
  0xaa   :  { %v66_v19 = vrot.slane %v46_v16, %v61_v13 }
  0xac   :  { %v68_v20 = vsel %vm67_vm1, %v66_v19, %v62_v18 }
  0xad   :  { %v70_v21 = vsel %vm69_vm2, %v68_v20, 0 }
  0xae   :  { %v138_v23 = vand.u32 4294901760, %v70_v21 }
  0xb0   :  { %v139_v24 = vsub.f32 %v70_v21, %v138_v23 }
  0xb2   :  { %v140_v26 = vand.u32 4294901760, %v139_v24 }
  0xb4   :  { %v141_v27 = vsub.f32 %v139_v24, %v140_v26 }
  0xb6   :  { %v142_v29 = vand.u32 4294901760, %v141_v27 }
  0xb8   :  { %1063 = vmatmul.mubr.f32.vlgmr.msra.gmra.mrb[0].mxu0 %v142_v29 }
  0xb9   :  { %1066 = vmatpush3.msra.mxu0 %v153_v28  ;;  %1067 = vmatprep.mubr.msk.f32.mxu0 %vm1208_vm0, %v1207_v7 }
  0xba   :  { %1070 = vmatprep.subr.mxu0 %v1207_v7 }
  0xc0   :  { %1068 = vmatmul.mubr.f32.vlgmr.msra.gmra.mrb[0].mxu0 %v138_v23 }
  0xc1   :  { %1071 = vmatpush3.msra.mxu0 %v150_v17  ;;  %1072 = vmatprep.mubr.msk.f32.mxu0 %vm1208_vm0, %v1207_v7 }
  0xc2   :  { %1075 = vmatprep.subr.mxu0 %v1207_v7 }
  0xc8   :  { %1073 = vmatmul.mubr.f32.vlgmr.msra.gmra.mrb[0].mxu0 %v139_v24 }
  0xc9   :  { %1076 = vmatpush3.msra.mxu0 %v73_v8  ;;  %1077 = vmatprep.mubr.msk.f32.mxu0 %vm1208_vm0, %v1207_v7 }
  0xca   :  { %1080 = vmatprep.subr.mxu0 %v1207_v7 }
  0xd0   :  { %1078 = vmatmul.mubr.f32.vlgmr.msra.gmra.mrb[0].mxu0 %v140_v26 }
  0xd1   :  { %1081 = vmatpush3.msra.mxu0 %v151_v22  ;;  %1082 = vmatprep.mubr.msk.f32.mxu0 %vm1208_vm0, %v1207_v7 }
  0xd2   :  { %1085 = vmatprep.subr.mxu0 %v1207_v7 }
  0xd8   :  { %1083 = vmatmul.mubr.f32.vlgmr.msra.gmra.mrb[0].mxu0 %v138_v23 }
  0xd9   :  { %1086 = vmatpush3.msra.mxu0 %v73_v8  ;;  %1087 = vmatprep.mubr.msk.f32.mxu0 %vm1208_vm0, %v1207_v7 }
  0xe0   :  { %1088 = vmatmul.mubr.f32.vlgmr.msra.gmra.mrb[0].mxu0 %v138_v23 }
 0x1b3   :  { %v514_v34 = vpop.f32.mrb[0].mxu0 }
 0x1b4   :  { %v1120_v35 = vadd.f32 %v1032_v33, %v514_v34  ;;  %v1089_v36 = vpop.f32.mrb[1].mxu0 }
 0x1b6   :  { %v1033_v37 = vmul.f32 -1.442695, %v1120_v35 }
 0x1b8   :  { %1148 = vpow2.f32 %v1033_v37 }
 0x1c2   :  { %v1149_v38 = vpop.eup %1148 }
 0x1c3   :  { %v521_v39 = vadd.f32 1.0, %v1149_v38 }
 0x1c5   :  { %1150 = vrcp.f32 %v521_v39 }
 0x1cf   :  { %v1151_v41 = vpop.eup %1150 }
 0x1d0   :  { %v524_v42 = vmul.f32 %v1151_v41, %v1120_v35 }
 0x1d2   :  { %v535_v43 = vsel %vm533_vm4, %v524_v42, 0 }
 0x1d3   :  { %v607_v45 = vand.u32 4294901760, %v535_v43 }
 0x1d5   :  { %v608_v46 = vsub.f32 %v535_v43, %v607_v45 }
 0x1d7   :  { %v609_v48 = vand.u32 4294901760, %v608_v46 }
 0x1d9   :  { %v610_v49 = vsub.f32 %v608_v46, %v609_v48 }
 0x1db   :  { %v611_v51 = vand.u32 4294901760, %v610_v49 }
 0x1dd   :  { %1093 = vmatmul.mubr.f32.vlgmr.msra.gmra.mrb[0].mxu1 %v611_v51 }
 0x1de   :  { %1096 = vmatpush3.msra.mxu1 %v622_v50  ;;  %1097 = vmatprep.mubr.msk.f32.mxu1 %vm1208_vm0, %v1207_v7 }
 0x1df   :  { %1100 = vmatprep.subr.mxu1 %v1207_v7 }
 0x1e5   :  { %1098 = vmatmul.mubr.f32.vlgmr.msra.gmra.mrb[0].mxu1 %v607_v45 }
 0x1e6   :  { %1101 = vmatpush3.msra.mxu1 %v619_v40  ;;  %1102 = vmatprep.mubr.msk.f32.mxu1 %vm1208_vm0, %v1207_v7 }
 0x1e7   :  { %1105 = vmatprep.subr.mxu1 %v1207_v7 }
 0x1ed   :  { %1103 = vmatmul.mubr.f32.vlgmr.msra.gmra.mrb[0].mxu1 %v608_v46 }
 0x1ee   :  { %1106 = vmatpush3.msra.mxu1 %v542_v32  ;;  %1107 = vmatprep.mubr.msk.f32.mxu1 %vm1208_vm0, %v1207_v7 }
 0x1ef   :  { %1110 = vmatprep.subr.mxu1 %v1207_v7 }
 0x1f5   :  { %1108 = vmatmul.mubr.f32.vlgmr.msra.gmra.mrb[0].mxu1 %v609_v48 }
 0x1f6   :  { %1111 = vmatpush3.msra.mxu1 %v620_v44  ;;  %1112 = vmatprep.mubr.msk.f32.mxu1 %vm1208_vm0, %v1207_v7 }
 0x1f7   :  { %1115 = vmatprep.subr.mxu1 %v1207_v7 }
 0x1fd   :  { %1113 = vmatmul.mubr.f32.vlgmr.msra.gmra.mrb[0].mxu1 %v607_v45 }
 0x1fe   :  { %1116 = vmatpush3.msra.mxu1 %v542_v32  ;;  %1117 = vmatprep.mubr.msk.f32.mxu1 %vm1208_vm0, %v1207_v7 }
 0x205   :  { %1118 = vmatmul.mubr.f32.vlgmr.msra.gmra.mrb[0].mxu1 %v607_v45 }
 0x2d8   :  { %v983_v53 = vpop.f32.mrb[0].mxu1 }
 0x2d9   :  { %v1121_v54 = vadd.f32 %v1034_v52, %v983_v53  ;;  %v1119_v55 = vpop.f32.mrb[1].mxu1 }
 0x2db   :  { %v1035_v56 = vmul.f32 -1.442695, %v1121_v54 }
 0x2dd   :  { %1152 = vpow2.f32 %v1035_v56 }
 0x2e7   :  { %v1153_v57 = vpop.eup %1152 }
 0x2e8   :  { %v990_v58 = vadd.f32 1.0, %v1153_v57 }
 0x2ea   :  { %1154 = vrcp.f32 %v990_v58 }
 0x2f4   :  { %v1155_v60 = vpop.eup %1154 }
 0x2f5   :  { %v996_v61 = vrot.slane %v1155_v60, %v995_v59  ;;  %v1003_v63 = vrot.slane %v1155_v60, %v1002_v62 }
 0x2f7   :  { %998 = vbcast.lane.b32.xlu1 %v996_v61, 256 }
 0x2fb   :  { %1005 = vbcast.lane.b32.xlu1 %v1003_v63, 256 }
 0x369   :  { %v999_v3 = vpop.permute.xlu1 %998 }
 0x36a   :  { %v1007_v5 = vmul.f32 %v999_v3, %v1255_v0  ;;  %v1008_v6 = vmul.f32 %v999_v3, %v1257_v1 }
 0x36c   :  { %1011 = vst [vmem:[#allocation5] sm:$0xff] %v1007_v5  ;;  %1012 = vst [vmem:[#allocation5 + $0x8] sm:$0xff] %v1008_v6 }
 0x36d   :  { %v1006_v7 = vpop.permute.xlu1 %1005 }
 0x36e   :  { %v1009_v8 = vmul.f32 %v1006_v7, %v1259_v2  ;;  %v1010_v9 = vmul.f32 %v1006_v7, %v1263_v4 }
 0x370   :  { %1013 = vst [vmem:[#allocation5 + $0x10] sm:$0xff] %v1009_v8  ;;  %1014 = vst [vmem:[#allocation5 + $0x18] sm:$0xff] %v1010_v9 }
 0x371   :  { %1189 = shalt.err (!%p1186_p12)
}
 0x372   :  { %s1190_s15 = scalar_lea.hbm %s1344_s5, 512 }
 0x373   :  { %p1191_p13 = scmp.ne.s32.totalorder %s1344_s5, %s1190_s15  ;;  %p1194_p0 = scmp.lt.u32.totalorder %s1190_s15, %s1344_s5 }
 0x375   :  { %p1196_p1 = pnand %p1194_p0, %p1191_p13 }
 0x377   :  { %1199 = shalt.err (!%p1196_p1)
}
 0x378   :  { %1026 = dma.vmem_to_hbm [thread:$0]  %s1021_s11, 512, %s1344_s5, [#allocation4], %s1205_s28, %s1205_s28, %s1206_s29  }
 0x379   :  { %1202 = dma.done.wait [#allocation4], 512  }
 0x37a   :  { %1203 = vsyncadd [#allocation4], 4294966784 }
 0x37b   :  { %1030 = vsyncpa [#allocation3], 1 }
 0x37c   :  { %1031 = vsyncpa [#allocation4], 1 }

// kernel: tpu_custom_call.1
= control target key start
LH: loop header
LB: loop body
LE: loop exit
PB: predicated region body
PF: predicated region fallthrough
CT: control target
= control target key end

     0   :  { %10 = vsyncpa [#allocation3], 0  ;;  %s1339_s0 = inlined_call_operand.hbm [shape: f32[2,8,256], index: 0, kind: input, shape index: {}]   ;;  %s1340_s1 = inlined_call_operand.vmem [shape: f32[8,4], index: 1, kind: input, shape index: {}]   ;;  %s1341_s2 = inlined_call_operand.vmem [shape: f32[1,4], index: 2, kind: input, shape index: {}]   ;;  %s1342_s3 = inlined_call_operand.vmem [shape: f32[4,8], index: 3, kind: input, shape index: {}]   ;;  %s1343_s4 = inlined_call_operand.vmem [shape: f32[1,8], index: 4, kind: input, shape index: {}]   ;;  %s1344_s5 = inlined_call_operand.hbm [shape: f32[2,8,256], index: 5, kind: output, shape index: {}]  }
   0x1   :  { %11 = vsyncpa [#allocation4], 0  ;;  %s1204_s18 = smov [#allocation2]   ;;  %s1156_s22 = scalar_lea.hbm %s1339_s0, 512 }
   0x2   :  { %s17_s19 = sshll.u32 %s1204_s18, 4  ;;  %p1157_p0 = scmp.ne.s32.totalorder %s1339_s0, %s1156_s22  ;;  %s18_s19 = int_to_ptr.vmem [resolvable:$true] %s17_s19 }
   0x3   :  { %p1160_p1 = scmp.lt.u32.totalorder %s1156_s22, %s1339_s0 }
   0x5   :  { %p1162_p2 = pnand %p1160_p1, %p1157_p0 }
   0x7   :  { %1165 = shalt.err (!%p1162_p2)
}
   0x8   :  { %s1166_s27 = scalar_lea.vmem %s18_s19, 512  ;;  %p1171_p4 = scmp.lt.s32.totalorder %s18_s19, %s18_s19 }
   0x9   :  { %p1167_p3 = scmp.ne.s32.totalorder %s18_s19, %s1166_s27  ;;  %p1172_p5 = scmp.lt.s32.totalorder %s1166_s27, %s1166_s27 }
   0xb   :  { %p1173_p6 = por %p1172_p5, %p1171_p4 }
   0xd   :  { %p1174_p7 = pnand %p1173_p6, %p1167_p3 }
   0xf   :  { %1177 = shalt.err (!%p1174_p7)
}
  0x10   :  { %s1205_s28 = smov 256   ;;  %s1206_s29 = smov 16  }
  0x11   :  { %23 = dma.hbm_to_vmem [thread:$0]  %s1339_s0, 512, %s18_s19, [#allocation3], %s1205_s28, %s1205_s28, %s1206_s29  }
  0x12   :  { %1200 = dma.done.wait [#allocation3], 512  }
  0x13   :  { %1201 = vsyncadd [#allocation3], 4294966784  ;;  %v1255_v0 = vld [vmem:[#allocation2] sm:$0xff]  ;;  %v1257_v1 = vld [vmem:[#allocation2 + $0x8] sm:$0xff]  ;;  %v1207_v7 = vmov 0.0   ;;  %vm1208_vm0 = vmmov 0   ;;  %v57_v9 = vlaneseq }
  0x14   :  { %v1259_v2 = vld [vmem:[#allocation2 + $0x10] sm:$0xff]  ;;  %v39_v3 = vadd.f32 %v1257_v1, %v1255_v0  ;;  %v1263_v4 = vld [vmem:[#allocation2 + $0x18] sm:$0xff]  ;;  %v47_v6 = vld [vmem:[%s1340_s1] sm:$0xff]  ;;  %1060 = vmatprep.subr.mxu0 %v1207_v7  ;;  %1062 = vmatprep.mubr.msk.f32.mxu0 %vm1208_vm0, %v1207_v7  ;;  %vm67_vm1 = vcmask 1041409   ;;  %vm69_vm2 = vcmask 64512   ;;  %vm537_vm3 = vcmask 1043456  }
  0x15   :  { %v42_v5 = vadd.f32 %v1263_v4, %v1259_v2  ;;  %v73_v8 = vand.u32 4294901760, %v47_v6  ;;  %1090 = vmatprep.subr.mxu1 %v1207_v7  ;;  %1092 = vmatprep.mubr.msk.f32.mxu1 %vm1208_vm0, %v1207_v7  ;;  %v58_v10 = vand.u32 127, %v57_v9  ;;  %v1277_v11 = vshrl.u32 %v57_v9, 7  ;;  %v525_v30 = vld [vmem:[%s1342_s3] sm:$0xf] }
  0x16   :  { %40 = vadd.xlane.f32.xlu0 %v39_v3  ;;  %v539_v31 = vsel %vm537_vm3, %v525_v30, 0  ;;  %v1032_v33 = vld [vmem:[%s1341_s2] ss:$0 sm:$0xff]  ;;  %vm533_vm4 = vcmask 31744  }
  0x17   :  { %1061 = vmatpush3.msra.mxu0 %v73_v8  ;;  %v61_v13 = vsub.s32 %v58_v10, %v1277_v11  ;;  %v150_v17 = vsub.f32 %v47_v6, %v73_v8  ;;  %v542_v32 = vand.u32 4294901760, %v539_v31  ;;  %v1034_v52 = vld [vmem:[%s1343_s4] ss:$0 sm:$0xff]  ;;  %v995_v59 = vsub.s32 0, %v1277_v11  ;;  %s1209_s4 = smov [#allocation5]  }
  0x18   :  { %1065 = vmatprep.subr.mxu0 %v1207_v7  ;;  %v1002_v62 = vsub.s32 1, %v1277_v11  ;;  %s1020_s11 = sshll.u32 %s1209_s4, 4  ;;  %s1021_s11 = int_to_ptr.vmem [resolvable:$true] %s1020_s11 }
  0x19   :  { %v151_v22 = vand.u32 4294901760, %v150_v17  ;;  %1091 = vmatpush3.msra.mxu1 %v542_v32  ;;  %v619_v40 = vsub.f32 %v539_v31, %v542_v32  ;;  %s1178_s12 = scalar_lea.vmem %s1021_s11, 512  ;;  %p1183_p9 = scmp.lt.s32.totalorder %s1021_s11, %s1021_s11 }
  0x1a   :  { %43 = vadd.xlane.f32.xlu0 %v42_v5  ;;  %1095 = vmatprep.subr.mxu1 %v1207_v7  ;;  %p1179_p8 = scmp.ne.s32.totalorder %s1021_s11, %s1178_s12  ;;  %p1184_p10 = scmp.lt.s32.totalorder %s1178_s12, %s1178_s12 }
  0x1b   :  { %v152_v25 = vsub.f32 %v150_v17, %v151_v22  ;;  %v620_v44 = vand.u32 4294901760, %v619_v40 }
  0x1c   :  { %p1185_p11 = por %p1184_p10, %p1183_p9 }
  0x1d   :  { %v153_v28 = vand.u32 4294901760, %v152_v25  ;;  %v621_v47 = vsub.f32 %v619_v40, %v620_v44 }
  0x1e   :  { %p1186_p12 = pnand %p1185_p11, %p1179_p8 }
  0x1f   :  { %v622_v50 = vand.u32 4294901760, %v621_v47 }
  0xa3   :  { %v41_v12 = vpop.xlane.xlu0 %40 }
  0xa4   :  { %v45_v14 = vmul.f32 0.00390625, %v41_v12 }
  0xa6   :  { %v62_v18 = vrot.slane %v45_v14, %v61_v13 }
  0xa7   :  { %v44_v15 = vpop.xlane.xlu0 %43 }
  0xa8   :  { %v46_v16 = vmul.f32 0.00390625, %v44_v15 }
  0xaa   :  { %v66_v19 = vrot.slane %v46_v16, %v61_v13 }
  0xac   :  { %v68_v20 = vsel %vm67_vm1, %v66_v19, %v62_v18 }
  0xad   :  { %v70_v21 = vsel %vm69_vm2, %v68_v20, 0 }
  0xae   :  { %v138_v23 = vand.u32 4294901760, %v70_v21 }
  0xb0   :  { %v139_v24 = vsub.f32 %v70_v21, %v138_v23 }
  0xb2   :  { %v140_v26 = vand.u32 4294901760, %v139_v24 }
  0xb4   :  { %v141_v27 = vsub.f32 %v139_v24, %v140_v26 }
  0xb6   :  { %v142_v29 = vand.u32 4294901760, %v141_v27 }
  0xb8   :  { %1063 = vmatmul.mubr.f32.vlgmr.msra.gmra.mrb[0].mxu0 %v142_v29 }
  0xb9   :  { %1066 = vmatpush3.msra.mxu0 %v153_v28  ;;  %1067 = vmatprep.mubr.msk.f32.mxu0 %vm1208_vm0, %v1207_v7 }
  0xba   :  { %1070 = vmatprep.subr.mxu0 %v1207_v7 }
  0xc0   :  { %1068 = vmatmul.mubr.f32.vlgmr.msra.gmra.mrb[0].mxu0 %v138_v23 }
  0xc1   :  { %1071 = vmatpush3.msra.mxu0 %v150_v17  ;;  %1072 = vmatprep.mubr.msk.f32.mxu0 %vm1208_vm0, %v1207_v7 }
  0xc2   :  { %1075 = vmatprep.subr.mxu0 %v1207_v7 }
  0xc8   :  { %1073 = vmatmul.mubr.f32.vlgmr.msra.gmra.mrb[0].mxu0 %v139_v24 }
  0xc9   :  { %1076 = vmatpush3.msra.mxu0 %v73_v8  ;;  %1077 = vmatprep.mubr.msk.f32.mxu0 %vm1208_vm0, %v1207_v7 }
  0xca   :  { %1080 = vmatprep.subr.mxu0 %v1207_v7 }
  0xd0   :  { %1078 = vmatmul.mubr.f32.vlgmr.msra.gmra.mrb[0].mxu0 %v140_v26 }
  0xd1   :  { %1081 = vmatpush3.msra.mxu0 %v151_v22  ;;  %1082 = vmatprep.mubr.msk.f32.mxu0 %vm1208_vm0, %v1207_v7 }
  0xd2   :  { %1085 = vmatprep.subr.mxu0 %v1207_v7 }
  0xd8   :  { %1083 = vmatmul.mubr.f32.vlgmr.msra.gmra.mrb[0].mxu0 %v138_v23 }
  0xd9   :  { %1086 = vmatpush3.msra.mxu0 %v73_v8  ;;  %1087 = vmatprep.mubr.msk.f32.mxu0 %vm1208_vm0, %v1207_v7 }
  0xe0   :  { %1088 = vmatmul.mubr.f32.vlgmr.msra.gmra.mrb[0].mxu0 %v138_v23 }
 0x1b3   :  { %v514_v34 = vpop.f32.mrb[0].mxu0 }
 0x1b4   :  { %v1120_v35 = vadd.f32 %v1032_v33, %v514_v34  ;;  %v1089_v36 = vpop.f32.mrb[1].mxu0 }
 0x1b6   :  { %v1033_v37 = vmul.f32 -1.442695, %v1120_v35 }
 0x1b8   :  { %1148 = vpow2.f32 %v1033_v37 }
 0x1c2   :  { %v1149_v38 = vpop.eup %1148 }
 0x1c3   :  { %v521_v39 = vadd.f32 1.0, %v1149_v38 }
 0x1c5   :  { %1150 = vrcp.f32 %v521_v39 }
 0x1cf   :  { %v1151_v41 = vpop.eup %1150 }
 0x1d0   :  { %v524_v42 = vmul.f32 %v1151_v41, %v1120_v35 }
 0x1d2   :  { %v535_v43 = vsel %vm533_vm4, %v524_v42, 0 }
 0x1d3   :  { %v607_v45 = vand.u32 4294901760, %v535_v43 }
 0x1d5   :  { %v608_v46 = vsub.f32 %v535_v43, %v607_v45 }
 0x1d7   :  { %v609_v48 = vand.u32 4294901760, %v608_v46 }
 0x1d9   :  { %v610_v49 = vsub.f32 %v608_v46, %v609_v48 }
 0x1db   :  { %v611_v51 = vand.u32 4294901760, %v610_v49 }
 0x1dd   :  { %1093 = vmatmul.mubr.f32.vlgmr.msra.gmra.mrb[0].mxu1 %v611_v51 }
 0x1de   :  { %1096 = vmatpush3.msra.mxu1 %v622_v50  ;;  %1097 = vmatprep.mubr.msk.f32.mxu1 %vm1208_vm0, %v1207_v7 }
 0x1df   :  { %1100 = vmatprep.subr.mxu1 %v1207_v7 }
 0x1e5   :  { %1098 = vmatmul.mubr.f32.vlgmr.msra.gmra.mrb[0].mxu1 %v607_v45 }
 0x1e6   :  { %1101 = vmatpush3.msra.mxu1 %v619_v40  ;;  %1102 = vmatprep.mubr.msk.f32.mxu1 %vm1208_vm0, %v1207_v7 }
 0x1e7   :  { %1105 = vmatprep.subr.mxu1 %v1207_v7 }
 0x1ed   :  { %1103 = vmatmul.mubr.f32.vlgmr.msra.gmra.mrb[0].mxu1 %v608_v46 }
 0x1ee   :  { %1106 = vmatpush3.msra.mxu1 %v542_v32  ;;  %1107 = vmatprep.mubr.msk.f32.mxu1 %vm1208_vm0, %v1207_v7 }
 0x1ef   :  { %1110 = vmatprep.subr.mxu1 %v1207_v7 }
 0x1f5   :  { %1108 = vmatmul.mubr.f32.vlgmr.msra.gmra.mrb[0].mxu1 %v609_v48 }
 0x1f6   :  { %1111 = vmatpush3.msra.mxu1 %v620_v44  ;;  %1112 = vmatprep.mubr.msk.f32.mxu1 %vm1208_vm0, %v1207_v7 }
 0x1f7   :  { %1115 = vmatprep.subr.mxu1 %v1207_v7 }
 0x1fd   :  { %1113 = vmatmul.mubr.f32.vlgmr.msra.gmra.mrb[0].mxu1 %v607_v45 }
 0x1fe   :  { %1116 = vmatpush3.msra.mxu1 %v542_v32  ;;  %1117 = vmatprep.mubr.msk.f32.mxu1 %vm1208_vm0, %v1207_v7 }
 0x205   :  { %1118 = vmatmul.mubr.f32.vlgmr.msra.gmra.mrb[0].mxu1 %v607_v45 }
 0x2d8   :  { %v983_v53 = vpop.f32.mrb[0].mxu1 }
 0x2d9   :  { %v1121_v54 = vadd.f32 %v1034_v52, %v983_v53  ;;  %v1119_v55 = vpop.f32.mrb[1].mxu1 }
 0x2db   :  { %v1035_v56 = vmul.f32 -1.442695, %v1121_v54 }
 0x2dd   :  { %1152 = vpow2.f32 %v1035_v56 }
 0x2e7   :  { %v1153_v57 = vpop.eup %1152 }
 0x2e8   :  { %v990_v58 = vadd.f32 1.0, %v1153_v57 }
 0x2ea   :  { %1154 = vrcp.f32 %v990_v58 }
 0x2f4   :  { %v1155_v60 = vpop.eup %1154 }
 0x2f5   :  { %v996_v61 = vrot.slane %v1155_v60, %v995_v59  ;;  %v1003_v63 = vrot.slane %v1155_v60, %v1002_v62 }
 0x2f7   :  { %998 = vbcast.lane.b32.xlu1 %v996_v61, 256 }
 0x2fb   :  { %1005 = vbcast.lane.b32.xlu1 %v1003_v63, 256 }
 0x369   :  { %v999_v3 = vpop.permute.xlu1 %998 }
 0x36a   :  { %v1007_v5 = vmul.f32 %v999_v3, %v1255_v0  ;;  %v1008_v6 = vmul.f32 %v999_v3, %v1257_v1 }
 0x36c   :  { %1011 = vst [vmem:[#allocation5] sm:$0xff] %v1007_v5  ;;  %1012 = vst [vmem:[#allocation5 + $0x8] sm:$0xff] %v1008_v6 }
 0x36d   :  { %v1006_v7 = vpop.permute.xlu1 %1005 }
 0x36e   :  { %v1009_v8 = vmul.f32 %v1006_v7, %v1259_v2  ;;  %v1010_v9 = vmul.f32 %v1006_v7, %v1263_v4 }
 0x370   :  { %1013 = vst [vmem:[#allocation5 + $0x10] sm:$0xff] %v1009_v8  ;;  %1014 = vst [vmem:[#allocation5 + $0x18] sm:$0xff] %v1010_v9 }
 0x371   :  { %1189 = shalt.err (!%p1186_p12)
}
 0x372   :  { %s1190_s15 = scalar_lea.hbm %s1344_s5, 512 }
 0x373   :  { %p1191_p13 = scmp.ne.s32.totalorder %s1344_s5, %s1190_s15  ;;  %p1194_p0 = scmp.lt.u32.totalorder %s1190_s15, %s1344_s5 }
 0x375   :  { %p1196_p1 = pnand %p1194_p0, %p1191_p13 }
 0x377   :  { %1199 = shalt.err (!%p1196_p1)
}
 0x378   :  { %1026 = dma.vmem_to_hbm [thread:$0]  %s1021_s11, 512, %s1344_s5, [#allocation4], %s1205_s28, %s1205_s28, %s1206_s29  }
 0x379   :  { %1202 = dma.done.wait [#allocation4], 512  }
 0x37a   :  { %1203 = vsyncadd [#allocation4], 4294966784 }
 0x37b   :  { %1030 = vsyncpa [#allocation3], 1 }
 0x37c   :  { %1031 = vsyncpa [#allocation4], 1 }

</bundles_post_ra>
